<compile_context>
chip_gen: v5e
topology: v5e:2x2
jax: 0.10.0
libtpu: 0.0.40
codegen_flags: <defaults>
</compile_context>

<pallas_src>
import functools

import jax
import jax.numpy as jnp
from jax.experimental import pallas as pl
from jax.experimental.pallas import tpu as pltpu

LAYERS = [2, 25, 25, 3]


def _cdiv(a, b):
    return (a + b - 1) // b


def _round_up(n, m):
    return _cdiv(n, m) * m


def mlp_kernel(x_ref, w1_ref, b1_ref, w2_ref, b2_ref, w3_ref, b3_ref, o_ref):
    """Lane-dense MLP tile: activations are (features, batch_tile), batch on lanes."""
    # ---- Layer 1 (in=2 -> 25) on the VPU --------------------------------------
    # K=2 is far too small for the MXU (native 128/256 contraction); two
    # broadcast multiply-adds avoid a third of the vmatmul pushes per tile.
    w1 = w1_ref[...]                                         # (25, 2)
    x0 = x_ref[0:1, :]                                       # (1, tb)  row 0 of x
    x1 = x_ref[1:2, :]                                       # (1, tb)  row 1 of x
    h = w1[:, 0:1] * x0 + w1[:, 1:2] * x1 + b1_ref[...]      # (25, tb) via broadcasts
    h = jnp.maximum(h, 0.0)

    # ---- Layer 2 (25 -> 25) on the MXU -----------------------------------------
    h = jnp.dot(w2_ref[...], h, preferred_element_type=jnp.float32)   # (25, tb)
    h = jnp.maximum(h + b2_ref[...], 0.0)

    # ---- Layer 3 (25 -> 3), no activation ---------------------------------------
    y = jnp.dot(w3_ref[...], h, preferred_element_type=jnp.float32)   # (3, tb)
    o_ref[...] = (y + b3_ref[...]).astype(o_ref.dtype)


def prepare_params(params):
    """One-time param layout prep (hoisted out of the per-call forward).

    Weights keep the PyTorch (out, in) layout (used directly as W @ h);
    biases become (out, 1) columns that broadcast along the lane (batch) axis.
    """
    return {
        "W1": params["W1"], "W2": params["W2"], "W3": params["W3"],
        "b1": params["b1"].reshape(-1, 1),
        "b2": params["b2"].reshape(-1, 1),
        "b3": params["b3"].reshape(-1, 1),
    }


def network_forward_feature_major(x_fm, kparams, *, tb=32768):
    """Zero-transpose path. x_fm: (2, batch) float32. Returns (3, batch) float32."""
    d_in, batch = x_fm.shape
    d_out = LAYERS[-1]
    assert d_in == LAYERS[0], f"expected {LAYERS[0]} input features, got {d_in}"

    # --- batch tile selection ---------------------------------------------------
    tb = max(128, _round_up(int(tb), 128))        # keep lane-dense (8,128) property
    lane_tiles = _cdiv(batch, 128)
    # Keep >=2 grid steps when the batch spans >=2 lane tiles so the "parallel"
    # axis can shard across both TensorCores on v7x (no-op on v5e/v6e).
    min_steps = 2 if lane_tiles >= 2 else 1
    tb = max(128, min(tb, _cdiv(lane_tiles, min_steps) * 128))
    grid = (_cdiv(batch, tb),)

    # Live VMEM/step ~ 512*tb B (x/out double-buffered tiles padded to 8 sublanes
    # + two (25, tb) f32 intermediates padded to 32 sublanes). Add margin, cap
    # below every generation's physical VMEM (v7x: 64 MiB per TC).
    vmem_limit = int(min(max(768 * tb + (4 << 20), 16 << 20), 48 << 20))

    def const_spec(arr):
        # Full-array block, constant index -> DMA'd once, VMEM-resident across steps.
        return pl.BlockSpec(arr.shape, lambda i: (0, 0))

    return pl.pallas_call(
        mlp_kernel,
        out_shape=jax.ShapeDtypeStruct((d_out, batch), jnp.float32),
        grid=grid,
        in_specs=[
            pl.BlockSpec((d_in, tb), lambda i: (0, i)),   # x tile; last block clamped
            const_spec(kparams["W1"]),                    # (25, 2)
            const_spec(kparams["b1"]),                    # (25, 1)
            const_spec(kparams["W2"]),                    # (25, 25)
            const_spec(kparams["b2"]),                    # (25, 1)
            const_spec(kparams["W3"]),                    # (3, 25)
            const_spec(kparams["b3"]),                    # (3, 1)
        ],
        out_specs=pl.BlockSpec((d_out, tb), lambda i: (0, i)),
        compiler_params=pltpu.CompilerParams(
            dimension_semantics=("parallel",),
            vmem_limit_bytes=vmem_limit),
    )(x_fm, kparams["W1"], kparams["b1"], kparams["W2"], kparams["b2"],
      kparams["W3"], kparams["b3"])


def network_forward(x, kparams, *, tb=32768):
    """PyTorch-layout wrapper: x (batch, 2) float32 -> (batch, 3) float32.

    The input/output transposes are pure layout plumbing (the kernel works
    feature-major); use network_forward_feature_major to skip them entirely.
    """
    return network_forward_feature_major(x.T, kparams, tb=tb).T


def init_params(key):
    """Deterministic init mimicking PyTorch Linear default (U(-1/sqrt(in), 1/sqrt(in)))."""
    params = {}
    keys = jax.random.split(key, 2 * (len(LAYERS) - 1))
    for i, (fan_in, fan_out) in enumerate(zip(LAYERS, LAYERS[1:])):
        bound = 1.0 / (fan_in ** 0.5)
        params[f"W{i+1}"] = jax.random.uniform(
            keys[2 * i], (fan_out, fan_in), jnp.float32, -bound, bound)
        params[f"b{i+1}"] = jax.random.uniform(
            keys[2 * i + 1], (fan_out,), jnp.float32, -bound, bound)
    return params


def reference_forward(x, params):
    """Pure-JAX reference matching the PyTorch forward exactly."""
    h = jnp.maximum(x @ params["W1"].T + params["b1"], 0.0)
    h = jnp.maximum(h @ params["W2"].T + params["b2"], 0.0)
    return h @ params["W3"].T + params["b3"]


if __name__ == "__main__":
    key = jax.random.PRNGKey(0)
    k_params, k_x1, k_x2 = jax.random.split(key, 3)

    params = init_params(k_params)
    kparams = prepare_params(params)   # one-time layout prep (hoisted)

    # Primary test: small batch -> single (partial) 128-lane tile, one grid step.
    batch = 8
    x = jax.random.normal(k_x1, (batch, LAYERS[0]), jnp.float32)
    fwd = jax.jit(functools.partial(network_forward, tb=32768))
    out = jax.block_until_ready(fwd(x, kparams))
    ref = reference_forward(x, params)
    assert out.shape == (batch, LAYERS[-1])
    assert jnp.allclose(out, ref, atol=1e-4, rtol=1e-4), "mismatch vs reference (batch=8)"

    # Secondary test: ragged batch over multiple grid steps with a partial final tile.
    batch2 = 300
    x2 = jax.random.normal(k_x2, (batch2, LAYERS[0]), jnp.float32)
    out2 = jax.block_until_ready(network_forward(x2, kparams, tb=128))
    ref2 = reference_forward(x2, params)
    assert out2.shape == (batch2, LAYERS[-1])
    assert jnp.allclose(out2, ref2, atol=1e-4, rtol=1e-4), "mismatch vs reference (batch=300)"

    print("KERNEL_OK")
</pallas_src>

<mosaic_0001>
module attributes {stable_mosaic.version = 11 : i64} {
  func.func @mlp_kernel(%arg0: i32, %arg1: memref<2x128xf32, #tpu.memory_space<vmem>>, %arg2: memref<25x2xf32, #tpu.memory_space<vmem>>, %arg3: memref<25x1xf32, #tpu.memory_space<vmem>>, %arg4: memref<25x25xf32, #tpu.memory_space<vmem>>, %arg5: memref<25x1xf32, #tpu.memory_space<vmem>>, %arg6: memref<3x25xf32, #tpu.memory_space<vmem>>, %arg7: memref<3x1xf32, #tpu.memory_space<vmem>>, %arg8: memref<3x128xf32, #tpu.memory_space<vmem>>) attributes {dimension_semantics = [#tpu.dimension_semantics<parallel>], iteration_bounds = array<i64: 1>, scalar_prefetch = 0 : i64, scratch_operands = 0 : i64, tpu.core_type = #tpu.core_type<tc>, window_params = [{transform_indices = @transform_0, window_bounds = array<i64: 2, 128>}, {pipeline_mode = #tpu.pipeline_mode<synchronous>, transform_indices = @transform_1, window_bounds = array<i64: 25, 2>}, {pipeline_mode = #tpu.pipeline_mode<synchronous>, transform_indices = @transform_2, window_bounds = array<i64: 25, 1>}, {pipeline_mode = #tpu.pipeline_mode<synchronous>, transform_indices = @transform_3, window_bounds = array<i64: 25, 25>}, {pipeline_mode = #tpu.pipeline_mode<synchronous>, transform_indices = @transform_4, window_bounds = array<i64: 25, 1>}, {pipeline_mode = #tpu.pipeline_mode<synchronous>, transform_indices = @transform_5, window_bounds = array<i64: 3, 25>}, {pipeline_mode = #tpu.pipeline_mode<synchronous>, transform_indices = @transform_6, window_bounds = array<i64: 3, 1>}, {transform_indices = @transform_7, window_bounds = array<i64: 3, 128>}]} {
    %c0 = arith.constant 0 : index
    %c0_0 = arith.constant 0 : index
    %0 = vector.load %arg2[%c0, %c0_0] : memref<25x2xf32, #tpu.memory_space<vmem>>, vector<25x2xf32>
    %c0_1 = arith.constant 0 : index
    %c0_2 = arith.constant 0 : index
    %1 = vector.load %arg1[%c0_1, %c0_2] : memref<2x128xf32, #tpu.memory_space<vmem>>, vector<1x128xf32>
    %c1 = arith.constant 1 : index
    %c0_3 = arith.constant 0 : index
    %2 = vector.load %arg1[%c1, %c0_3] : memref<2x128xf32, #tpu.memory_space<vmem>>, vector<1x128xf32>
    %3 = vector.extract_strided_slice %0 {offsets = [0, 0], sizes = [25, 1], strides = [1, 1]} : vector<25x2xf32> to vector<25x1xf32>
    %4 = vector.broadcast %3 : vector<25x1xf32> to vector<25x128xf32>
    %5 = vector.broadcast %1 : vector<1x128xf32> to vector<25x128xf32>
    %6 = arith.mulf %4, %5 : vector<25x128xf32>
    %7 = vector.extract_strided_slice %0 {offsets = [0, 1], sizes = [25, 1], strides = [1, 1]} : vector<25x2xf32> to vector<25x1xf32>
    %8 = vector.broadcast %7 : vector<25x1xf32> to vector<25x128xf32>
    %9 = vector.broadcast %2 : vector<1x128xf32> to vector<25x128xf32>
    %10 = arith.mulf %8, %9 : vector<25x128xf32>
    %11 = arith.addf %6, %10 : vector<25x128xf32>
    %c0_4 = arith.constant 0 : index
    %c0_5 = arith.constant 0 : index
    %12 = vector.load %arg3[%c0_4, %c0_5] : memref<25x1xf32, #tpu.memory_space<vmem>>, vector<25x1xf32>
    %13 = vector.broadcast %12 : vector<25x1xf32> to vector<25x128xf32>
    %14 = arith.addf %11, %13 : vector<25x128xf32>
    %cst = arith.constant 0.000000e+00 : f32
    %15 = vector.broadcast %cst : f32 to vector<25x128xf32>
    %16 = arith.maximumf %14, %15 : vector<25x128xf32>
    %c0_6 = arith.constant 0 : index
    %c0_7 = arith.constant 0 : index
    %17 = vector.load %arg4[%c0_6, %c0_7] : memref<25x25xf32, #tpu.memory_space<vmem>>, vector<25x25xf32>
    %cst_8 = arith.constant dense<0.000000e+00> : vector<25x128xf32>
    %18 = tpu.matmul %17, %16, %cst_8 {dimension_numbers = #tpu.dot_dimension_numbers<[1], [0], [0], [1], [0, 0, 1, 1], [], []>} : vector<25x25xf32>, vector<25x128xf32>, vector<25x128xf32> -> vector<25x128xf32>
    %c0_9 = arith.constant 0 : index
    %c0_10 = arith.constant 0 : index
    %19 = vector.load %arg5[%c0_9, %c0_10] : memref<25x1xf32, #tpu.memory_space<vmem>>, vector<25x1xf32>
    %20 = vector.broadcast %19 : vector<25x1xf32> to vector<25x128xf32>
    %21 = arith.addf %18, %20 : vector<25x128xf32>
    %cst_11 = arith.constant 0.000000e+00 : f32
    %22 = vector.broadcast %cst_11 : f32 to vector<25x128xf32>
    %23 = arith.maximumf %21, %22 : vector<25x128xf32>
    %c0_12 = arith.constant 0 : index
    %c0_13 = arith.constant 0 : index
    %24 = vector.load %arg6[%c0_12, %c0_13] : memref<3x25xf32, #tpu.memory_space<vmem>>, vector<3x25xf32>
    %cst_14 = arith.constant dense<0.000000e+00> : vector<3x128xf32>
    %25 = tpu.matmul %24, %23, %cst_14 {dimension_numbers = #tpu.dot_dimension_numbers<[1], [0], [0], [1], [0, 0, 1, 1], [], []>} : vector<3x25xf32>, vector<25x128xf32>, vector<3x128xf32> -> vector<3x128xf32>
    %c0_15 = arith.constant 0 : index
    %c0_16 = arith.constant 0 : index
    %26 = vector.load %arg7[%c0_15, %c0_16] : memref<3x1xf32, #tpu.memory_space<vmem>>, vector<3x1xf32>
    %27 = vector.broadcast %26 : vector<3x1xf32> to vector<3x128xf32>
    %28 = arith.addf %25, %27 : vector<3x128xf32>
    %c0_17 = arith.constant 0 : index
    %c0_18 = arith.constant 0 : index
    %29 = vector.load %arg8[%c0_17, %c0_18] : memref<3x128xf32, #tpu.memory_space<vmem>>, vector<3x128xf32>
    tpu.vector_store %arg8[%c0_17, %c0_18], %28 {strides = array<i32>} : memref<3x128xf32, #tpu.memory_space<vmem>>, vector<3x128xf32>,
    return
  }
  func.func @transform_0(%arg0: i32) -> (i32, i32) {
    %c0_i32 = arith.constant 0 : i32
    %c0_i32_0 = arith.constant 0 : i32
    return %c0_i32, %arg0 : i32, i32
  }
  func.func @transform_1(%arg0: i32) -> (i32, i32) {
    %c0_i32 = arith.constant 0 : i32
    %c0_i32_0 = arith.constant 0 : i32
    %c0_i32_1 = arith.constant 0 : i32
    return %c0_i32, %c0_i32_0 : i32, i32
  }
  func.func @transform_2(%arg0: i32) -> (i32, i32) {
    %c0_i32 = arith.constant 0 : i32
    %c0_i32_0 = arith.constant 0 : i32
    %c0_i32_1 = arith.constant 0 : i32
    return %c0_i32, %c0_i32_0 : i32, i32
  }
  func.func @transform_3(%arg0: i32) -> (i32, i32) {
    %c0_i32 = arith.constant 0 : i32
    %c0_i32_0 = arith.constant 0 : i32
    %c0_i32_1 = arith.constant 0 : i32
    return %c0_i32, %c0_i32_0 : i32, i32
  }
  func.func @transform_4(%arg0: i32) -> (i32, i32) {
    %c0_i32 = arith.constant 0 : i32
    %c0_i32_0 = arith.constant 0 : i32
    %c0_i32_1 = arith.constant 0 : i32
    return %c0_i32, %c0_i32_0 : i32, i32
  }
  func.func @transform_5(%arg0: i32) -> (i32, i32) {
    %c0_i32 = arith.constant 0 : i32
    %c0_i32_0 = arith.constant 0 : i32
    %c0_i32_1 = arith.constant 0 : i32
    return %c0_i32, %c0_i32_0 : i32, i32
  }
  func.func @transform_6(%arg0: i32) -> (i32, i32) {
    %c0_i32 = arith.constant 0 : i32
    %c0_i32_0 = arith.constant 0 : i32
    %c0_i32_1 = arith.constant 0 : i32
    return %c0_i32, %c0_i32_0 : i32, i32
  }
  func.func @transform_7(%arg0: i32) -> (i32, i32) {
    %c0_i32 = arith.constant 0 : i32
    %c0_i32_0 = arith.constant 0 : i32
    return %c0_i32, %arg0 : i32, i32
  }
}

</mosaic_0001>

<bundles_post_ra>
// kernel: network_forward.1
= control target key start
LH: loop header
LB: loop body
LE: loop exit
PB: predicated region body
PF: predicated region fallthrough
CT: control target
= control target key end

     0   :  { %v298_v2 = vmov 0   ;;  %s413_s0 = inlined_call_operand.vmem [shape: f32[2,8], index: 0, kind: input, shape index: {}]   ;;  %s414_s1 = inlined_call_operand.vmem [shape: f32[25,2], index: 1, kind: input, shape index: {}]   ;;  %s415_s2 = inlined_call_operand.vmem [shape: f32[25,1], index: 2, kind: input, shape index: {}]   ;;  %s416_s3 = inlined_call_operand.vmem [shape: f32[25,25], index: 3, kind: input, shape index: {}]   ;;  %s417_s4 = inlined_call_operand.vmem [shape: f32[25,1], index: 4, kind: input, shape index: {}]   ;;  %s418_s5 = inlined_call_operand.vmem [shape: f32[3,25], index: 5, kind: input, shape index: {}]   ;;  %s419_s6 = inlined_call_operand.vmem [shape: f32[3,1], index: 6, kind: input, shape index: {}]   ;;  %s420_s7 = inlined_call_operand.hbm [shape: f32[3,8], index: 7, kind: output, shape index: {}]  }
   0x1   :  { %v30_v0 = vld [vmem:[%s414_s1 + $0x18] sm:$0x1]  ;;  %v29_v1 = vld [vmem:[%s414_s1 + $0x10] sm:$0xff]  ;;  %263 = vset.pattern.permute.xlu1 %v298_v2  ;;  %261 = vset.pattern.permute.xlu0 %v298_v2  ;;  %v28_v3 = vld [vmem:[%s414_s1 + $0x8] sm:$0xff] }
   0x2   :  { %50 = vperm.xlu0 %261, %v30_v0   ;;  %45 = vperm.xlu1 %263, %v29_v1  }
   0x3   :  { %265 = vset.pattern.permute.xlu2 %v298_v2 }
   0x4   :  { %40 = vperm.xlu2 %265, %v28_v3  }
   0x5   :  { %12 = vsyncpa [#allocation3], 0  ;;  %v299_v4 = vmov 1   ;;  %v27_v5 = vld [vmem:[%s414_s1] sm:$0xff]  ;;  %v86_v6 = vld [vmem:[%s415_s2 + $0x18] sm:$0x1] }
   0x6   :  { %v85_v7 = vld [vmem:[%s415_s2 + $0x10] sm:$0xff]  ;;  %v83_v8 = vld [vmem:[%s415_s2] sm:$0xff]  ;;  %v84_v9 = vld [vmem:[%s415_s2 + $0x8] sm:$0xff]  ;;  %vm156_vm0 = vcmask 1040384   ;;  %vm143_vm1 = vcmask 203776   ;;  %s300_s12 = smov [#allocation2]  }
   0x7   :  { %v122_v10 = vld [vmem:[%s417_s4 + $0x18] sm:$0x1]  ;;  %v194_v11 = vld [vmem:[%s419_s6] sm:$0x7]  ;;  %v121_v12 = vld [vmem:[%s417_s4 + $0x10] sm:$0xff]  ;;  %s232_s13 = sshll.u32 %s300_s12, 4  ;;  %s233_s13 = int_to_ptr.vmem [resolvable:$true] %s232_s13 }
   0x8   :  { %v120_v13 = vld [vmem:[%s417_s4 + $0x8] sm:$0xff]  ;;  %v119_v14 = vld [vmem:[%s417_s4] sm:$0xff]  ;;  %v117_v51 = vld [vmem:[%s416_s3 + $0x10] sm:$0xff]  ;;  %s234_s1 = sshll.u32 %s420_s7, 4  ;;  %s235_s1 = int_to_ptr.hbm [resolvable:$true] %s234_s1 }
   0x9   :  { %v271_v21 = vld [vmem:[%s413_s0 + $0x1] ss:$0 sm:$0xff]  ;;  %v270_v22 = vld [vmem:[%s413_s0] ss:$0 sm:$0xff]  ;;  %v116_v50 = vld [vmem:[%s416_s3 + $0x8] sm:$0xff] }
   0xa   :  { %262 = vset.pattern.permute.xlu0 %v299_v4  ;;  %264 = vset.pattern.permute.xlu1 %v299_v4  ;;  %v115_v49 = vld [vmem:[%s416_s3] sm:$0xff]  ;;  %v118_v52 = vld [vmem:[%s416_s3 + $0x18] sm:$0x1] }
   0xb   :  { %71 = vperm.xlu0 %262, %v30_v0   ;;  %67 = vperm.xlu1 %264, %v29_v1  }
   0xc   :  { %266 = vset.pattern.permute.xlu2 %v299_v4 }
   0xd   :  { %63 = vperm.xlu2 %266, %v28_v3  }
  0x13   :  { %267 = vset.pattern.permute.xlu1 %v298_v2  ;;  %59 = vperm.xlu0 %262, %v27_v5  }
  0x14   :  { %104 = vperm.xlu1 %267, %v86_v6  }
  0x15   :  { %268 = vset.pattern.permute.xlu2 %v298_v2 }
  0x16   :  { %35 = vperm.xlu2 %268, %v27_v5   ;;  %v193_v5 = vld [vmem:[%s418_s5] sm:$0x7] }
  0x1b   :  { %269 = vset.pattern.permute.xlu0 %v298_v2 }
  0x1c   :  { %99 = vperm.xlu1 %267, %v85_v7   ;;  %89 = vperm.xlu0 %269, %v83_v8  }
  0x1e   :  { %94 = vperm.xlu2 %268, %v84_v9  }
  0x24   :  { %140 = vperm.xlu1 %267, %v122_v10   ;;  %197 = vperm.xlu0 %269, %v194_v11  }
  0x26   :  { %135 = vperm.xlu2 %268, %v121_v12  }
  0x2c   :  { %130 = vperm.xlu1 %267, %v120_v13  }
  0x2e   :  { %125 = vperm.xlu2 %268, %v119_v14  }
  0x5e   :  { %v41_v15 = vpop.permute.xlu2 %40 }
  0x5f   :  { %v55_v28 = vmul.f32 %v270_v22, %v41_v15 }
  0x67   :  { %v64_v18 = vpop.permute.xlu2 %63 }
  0x68   :  { %v76_v29 = vmul.f32 %v271_v21, %v64_v18 }
  0x6a   :  { %v80_v34 = vadd.f32 %v76_v29, %v55_v28 }
  0x70   :  { %v36_v24 = vpop.permute.xlu2 %35 }
  0x71   :  { %v54_v35 = vmul.f32 %v270_v22, %v36_v24 }
  0x74   :  { %v46_v16 = vpop.permute.xlu1 %45  ;;  %v51_v17 = vpop.permute.xlu0 %50 }
  0x75   :  { %v57_v25 = vmul.f32 %v270_v22, %v51_v17  ;;  %v56_v36 = vmul.f32 %v270_v22, %v46_v16 }
  0x78   :  { %v95_v38 = vpop.permute.xlu2 %94 }
  0x79   :  { %v108_v42 = vadd.f32 %v95_v38, %v80_v34 }
  0x7b   :  { %v112_v47 = vmax.f32 %v108_v42, 0.0 }
  0x7d   :  { %v72_v19 = vpop.permute.xlu0 %71  ;;  %v68_v20 = vpop.permute.xlu1 %67 }
  0x7e   :  { %v78_v23 = vmul.f32 %v271_v21, %v72_v19  ;;  %v77_v32 = vmul.f32 %v271_v21, %v68_v20 }
  0x80   :  { %v82_v27 = vadd.f32 %v78_v23, %v57_v25  ;;  %v81_v39 = vadd.f32 %v77_v32, %v56_v36  ;;  %v136_v55 = vpop.permute.xlu2 %135 }
  0x85   :  { %v60_v26 = vpop.permute.xlu0 %59 }
  0x86   :  { %v105_v30 = vpop.permute.xlu1 %104  ;;  %v75_v37 = vmul.f32 %v271_v21, %v60_v26 }
  0x87   :  { %v110_v31 = vadd.f32 %v105_v30, %v82_v27 }
  0x88   :  { %v79_v44 = vadd.f32 %v75_v37, %v54_v35  ;;  %v126_v0 = vpop.permute.xlu2 %125 }
  0x89   :  { %v114_v33 = vmax.f32 %v110_v31, 0.0 }
  0x8b   :  { %243 = vmatpush.msk.msra.mxu0 %vm156_vm0, %v114_v33  ;;  %250 = vmatpush.msk.msra.mxu2 %vm156_vm0, %v114_v33 }
  0x8c   :  { %251 = vmatpush.msk.msra.mxu3 %vm156_vm0, %v114_v33 }
  0x8e   :  { %v100_v40 = vpop.permute.xlu1 %99  ;;  %v90_v41 = vpop.permute.xlu0 %89 }
  0x8f   :  { %v109_v43 = vadd.f32 %v100_v40, %v81_v39  ;;  %v107_v46 = vadd.f32 %v90_v41, %v79_v44 }
  0x91   :  { %v113_v45 = vmax.f32 %v109_v43, 0.0  ;;  %v111_v48 = vmax.f32 %v107_v46, 0.0 }
  0x93   :  { %173 = vmatpush.msra.mxu0 %v113_v45  ;;  %252 = vmatpush.msra.mxu2 %v113_v45 }
  0x94   :  { %253 = vmatpush.msra.mxu3 %v113_v45 }
  0x95   :  { %174 = vmatpush.msra.mxu0 %v112_v47  ;;  %254 = vmatpush.msra.mxu2 %v112_v47 }
  0x96   :  { %255 = vmatpush.msra.mxu3 %v112_v47  ;;  %v141_v53 = vpop.permute.xlu1 %140  ;;  %v198_v6 = vpop.permute.xlu0 %197 }
  0x97   :  { %175 = vmatpush.msra.mxu0 %v111_v48  ;;  %256 = vmatpush.msra.mxu2 %v111_v48 }
  0x98   :  { %257 = vmatpush.msra.mxu3 %v111_v48  ;;  %244 = vmatmul.msk.f32.vlgmr.msra.gmra.mxu0 %vm143_vm1, %v115_v49 }
  0x99   :  { %245 = vmatmul.msk.f32.vlgmr.msra.gmra.mxu2 %vm143_vm1, %v116_v50  ;;  %246 = vmatmul.msk.f32.vlgmr.msra.gmra.mxu3 %vm143_vm1, %v117_v51 }
  0x9e   :  { %v131_v60 = vpop.permute.xlu1 %130 }
  0xa1   :  { %247 = vmatmul.msk.f32.gmra.mxu3 %vm143_vm1, %v118_v52 }
 0x115   :  { %v177_v61 = vpop.f32.mrf.mxu0 }
 0x116   :  { %v178_v1 = vadd.f32 %v177_v61, %v126_v0 }
 0x118   :  { %v189_v4 = vmax.f32 %v178_v1, 0.0 }
 0x11c   :  { %v183_v54 = vpop.f32.mrf.mxu3  ;;  %v180_v56 = vpop.f32.mrf.mxu2 }
 0x11d   :  { %v184_v58 = vadd.f32 %v183_v54, %v136_v55  ;;  %v181_v62 = vadd.f32 %v180_v56, %v131_v60 }
 0x11f   :  { %v191_v2 = vmax.f32 %v184_v58, 0.0  ;;  %v190_v3 = vmax.f32 %v181_v62, 0.0 }
 0x124   :  { %v186_v57 = vpop.f32.mrf.mxu3 }
 0x125   :  { %v187_v59 = vadd.f32 %v186_v57, %v141_v53 }
 0x127   :  { %v192_v63 = vmax.f32 %v187_v59, 0.0 }
 0x129   :  { %248 = vmatpush.msk.msra.mxu1 %vm156_vm0, %v192_v63 }
 0x12b   :  { %219 = vmatpush.msra.mxu1 %v191_v2 }
 0x12d   :  { %220 = vmatpush.msra.mxu1 %v190_v3 }
 0x12f   :  { %221 = vmatpush.msra.mxu1 %v189_v4 }
 0x130   :  { %249 = vmatmul.msk.f32.vlgmr.msra.gmra.mxu1 %vm143_vm1, %v193_v5 }
 0x1ad   :  { %v223_v7 = vpop.f32.mrf.mxu1 }
 0x1ae   :  { %v224_v8 = vadd.f32 %v223_v7, %v198_v6 }
 0x1b0   :  { %226 = vst [vmem:[#allocation2] sm:$0x7] %v224_v8 }
 0x1b1   :  { %237 = dma.vmem_to_hbm [thread:$0]  %s233_s13, 64, %s235_s1, [#allocation3]  }
 0x1b2   :  { %296 = dma.done.wait [#allocation3], 64  }
 0x1b3   :  { %297 = vsyncadd [#allocation3], 4294967232 }
 0x1b4   :  { %242 = vsyncpa [#allocation3], 1 }

</bundles_post_ra>
